<compile_context>
chip_gen: v7x
topology: tpu7x:2x2x1
jax: 0.10.0
libtpu: 0.0.40
codegen_flags: <defaults>
</compile_context>

<pallas_src>
import jax
import jax.numpy as jnp
from jax import lax
from jax.experimental import pallas as pl
from jax.experimental.pallas import tpu as pltpu

EMBED_DIM = 20
NUM_HEADS = 2
HEAD_DIM = EMBED_DIM // NUM_HEADS
LN_EPS = 1e-5


def _make_kernel(batch: int, seq: int, num_heads: int, head_dim: int, eps: float):
    scale = float(head_dim) ** -0.5

    def kernel(x_ref, wq_ref, bq_ref, wk_ref, bk_ref, wv_ref, bv_ref,
               wo_ref, bo_ref, gamma_ref, beta_ref, out_ref):
        # x_ref / out_ref : (B*T, C)   (flattened in the wrapper)
        # wq/wk/wv        : (H, C, Dh) per-head input projections (pre-transposed)
        # bq/bk/bv        : (H, 1, Dh)
        # wo              : (H, Dh, C) per-head output projection rows
        # bo/gamma/beta   : (1, C)
        gamma = gamma_ref[...]
        beta = beta_ref[...]

        def layer_norm(h):
            mu = jnp.mean(h, axis=-1, keepdims=True)
            var = jnp.mean(jnp.square(h - mu), axis=-1, keepdims=True)
            return (h - mu) * lax.rsqrt(var + eps) * gamma + beta

        # NOTE: the module's `x = x + x` is intentionally omitted — LayerNorm is
        # scale invariant, so LN(2x) == LN(x) (up to ~eps/var ≈ 1e-6 here) and the
        # doubling never reaches the output.
        h = layer_norm(x_ref[...].astype(jnp.float32))      # (B*T, C)
        bo = bo_ref[...]                                     # (1, C)
        C = h.shape[1]

        for b in range(batch):                 # static loop; T==8 -> sublane-aligned
            lo = b * seq
            h_b = h[lo:lo + seq, :]            # (T, C) residual + attention input
            acc = jnp.zeros((seq, C), dtype=jnp.float32)

            for hd in range(num_heads):        # static loop; leading-axis weight index,
                                               # no lane slicing of activations
                qh = jnp.dot(h_b, wq_ref[hd],
                             preferred_element_type=jnp.float32) + bq_ref[hd]  # (T, Dh)
                kh = jnp.dot(h_b, wk_ref[hd],
                             preferred_element_type=jnp.float32) + bk_ref[hd]
                vh = jnp.dot(h_b, wv_ref[hd],
                             preferred_element_type=jnp.float32) + bv_ref[hd]

                # scores = qh @ kh^T (contract last dims; no explicit transpose)
                scores = lax.dot_general(
                    qh, kh, (((1,), (1,)), ((), ())),
                    preferred_element_type=jnp.float32) * scale                 # (T, T)

                m = jnp.max(scores, axis=-1, keepdims=True)
                p = jnp.exp(scores - m)
                p = p * pl.reciprocal(jnp.sum(p, axis=-1, keepdims=True),
                                      approx=True)
                ctx = jnp.dot(p, vh, preferred_element_type=jnp.float32)        # (T, Dh)
                acc = acc + jnp.dot(ctx, wo_ref[hd],
                                    preferred_element_type=jnp.float32)         # (T, C)

            out_b = layer_norm(h_b + acc + bo)                # residual + out_proj bias
            out_ref[pl.ds(lo, seq), :] = out_b.astype(out_ref.dtype)

    return kernel


def gemma3_siglip_attn_ln(x, wq, bq, wk, bk, wv, bv, wo, bo, gamma, beta):
    """x: (B, T, C) float32; weights are PyTorch-convention (out_features, in_features)."""
    B, T, C = x.shape
    H, Dh = NUM_HEADS, HEAD_DIM
    kernel = _make_kernel(B, T, H, Dh, LN_EPS)

    # Free wrapper-side reshapes: pre-split / pre-transpose weights per head so the
    # kernel does only aligned, full-width matmuls.
    wq_h = wq.T.reshape(C, H, Dh).transpose(1, 0, 2)      # (H, C, Dh)
    wk_h = wk.T.reshape(C, H, Dh).transpose(1, 0, 2)
    wv_h = wv.T.reshape(C, H, Dh).transpose(1, 0, 2)
    wo_h = wo.T.reshape(H, Dh, C)                          # (H, Dh, C)
    bq_h = bq.reshape(H, 1, Dh)
    bk_h = bk.reshape(H, 1, Dh)
    bv_h = bv.reshape(H, 1, Dh)

    vmem = pl.BlockSpec(memory_space=pltpu.MemorySpace.VMEM)
    args = (
        x.reshape(B * T, C),
        wq_h, bq_h, wk_h, bk_h, wv_h, bv_h,
        wo_h, bo.reshape(1, C),
        gamma.reshape(1, C), beta.reshape(1, C),
    )
    out = pl.pallas_call(
        kernel,
        out_shape=jax.ShapeDtypeStruct((B * T, C), jnp.float32),
        in_specs=[vmem] * len(args),
        out_specs=vmem,
    )(*args)
    return out.reshape(B, T, C)


def reference(x, wq, bq, wk, bk, wv, bv, wo, bo, gamma, beta):
    """Pure-JAX reference mirroring the PyTorch module exactly (including x + x)."""
    def ln(h):
        mu = jnp.mean(h, axis=-1, keepdims=True)
        var = jnp.mean((h - mu) ** 2, axis=-1, keepdims=True)
        return (h - mu) / jnp.sqrt(var + LN_EPS) * gamma + beta

    B, T, C = x.shape
    x = x + x
    h = ln(x)
    res = h
    q = (h @ wq.T + bq).reshape(B, T, NUM_HEADS, HEAD_DIM).transpose(0, 2, 1, 3)
    k = (h @ wk.T + bk).reshape(B, T, NUM_HEADS, HEAD_DIM).transpose(0, 2, 1, 3)
    v = (h @ wv.T + bv).reshape(B, T, NUM_HEADS, HEAD_DIM).transpose(0, 2, 1, 3)
    scores = jnp.einsum('bhtd,bhsd->bhts', q, k) * (HEAD_DIM ** -0.5)
    p = jax.nn.softmax(scores.astype(jnp.float32), axis=-1)
    ctx = jnp.einsum('bhts,bhsd->bhtd', p, v)
    ctx = ctx.transpose(0, 2, 1, 3).reshape(B, T, C)
    attn = ctx @ wo.T + bo
    return ln(res + attn)


if __name__ == "__main__":
    B, T, C = 2, 8, EMBED_DIM
    key = jax.random.PRNGKey(0)
    keys = jax.random.split(key, 11)
    x = jax.random.normal(keys[0], (B, T, C), dtype=jnp.float32)

    # Tolerance: pl.reciprocal(approx=True) normalizes softmax rows to ~1e-3
    # relative accuracy, so we check against 5e-3 (outputs are O(1) post-LN).
    TOL = 5e-3

    # --- Case 1: parameters exactly as the PyTorch module's __init__ builds them
    # (all attention weights / biases = 1, LayerNorm gamma = 1, beta = 0). ---
    ones_w = jnp.ones((C, C), jnp.float32)
    ones_b = jnp.ones((C,), jnp.float32)
    gamma1 = jnp.ones((C,), jnp.float32)
    beta0 = jnp.zeros((C,), jnp.float32)

    out1 = gemma3_siglip_attn_ln(x, ones_w, ones_b, ones_w, ones_b,
                                 ones_w, ones_b, ones_w, ones_b, gamma1, beta0)
    out1 = jax.block_until_ready(out1)
    ref1 = reference(x, ones_w, ones_b, ones_w, ones_b,
                     ones_w, ones_b, ones_w, ones_b, gamma1, beta0)
    assert out1.shape == (B, T, C)
    assert jnp.allclose(out1, ref1, rtol=TOL, atol=TOL), (
        f"ones-init max abs diff {jnp.max(jnp.abs(out1 - ref1))}")

    # --- Case 2: random parameters (catches head-split / transpose / ordering bugs
    # that the degenerate all-ones init cannot). ---
    sw = 0.2
    wq = sw * jax.random.normal(keys[1], (C, C), jnp.float32)
    bq = sw * jax.random.normal(keys[2], (C,), jnp.float32)
    wk = sw * jax.random.normal(keys[3], (C, C), jnp.float32)
    bk = sw * jax.random.normal(keys[4], (C,), jnp.float32)
    wv = sw * jax.random.normal(keys[5], (C, C), jnp.float32)
    bv = sw * jax.random.normal(keys[6], (C,), jnp.float32)
    wo = sw * jax.random.normal(keys[7], (C, C), jnp.float32)
    bo = sw * jax.random.normal(keys[8], (C,), jnp.float32)
    gamma = 1.0 + 0.2 * jax.random.normal(keys[9], (C,), jnp.float32)
    beta = 0.2 * jax.random.normal(keys[10], (C,), jnp.float32)

    out2 = gemma3_siglip_attn_ln(x, wq, bq, wk, bk, wv, bv, wo, bo, gamma, beta)
    out2 = jax.block_until_ready(out2)
    ref2 = reference(x, wq, bq, wk, bk, wv, bv, wo, bo, gamma, beta)
    assert out2.shape == (B, T, C)
    assert jnp.allclose(out2, ref2, rtol=TOL, atol=TOL), (
        f"random-init max abs diff {jnp.max(jnp.abs(out2 - ref2))}")

    print("KERNEL_OK")
</pallas_src>

<mosaic_0001>
module attributes {stable_mosaic.version = 11 : i64} {
  func.func @kernel(%arg0: memref<16x20xf32, #tpu.memory_space<vmem>>, %arg1: memref<2x20x10xf32, #tpu.memory_space<vmem>>, %arg2: memref<2x1x10xf32, #tpu.memory_space<vmem>>, %arg3: memref<2x20x10xf32, #tpu.memory_space<vmem>>, %arg4: memref<2x1x10xf32, #tpu.memory_space<vmem>>, %arg5: memref<2x20x10xf32, #tpu.memory_space<vmem>>, %arg6: memref<2x1x10xf32, #tpu.memory_space<vmem>>, %arg7: memref<2x10x20xf32, #tpu.memory_space<vmem>>, %arg8: memref<1x20xf32, #tpu.memory_space<vmem>>, %arg9: memref<1x20xf32, #tpu.memory_space<vmem>>, %arg10: memref<1x20xf32, #tpu.memory_space<vmem>>, %arg11: memref<16x20xf32, #tpu.memory_space<vmem>>) attributes {dimension_semantics = [], scalar_prefetch = 0 : i64, scratch_operands = 0 : i64, tpu.core_type = #tpu.core_type<tc>} {
    %c0 = arith.constant 0 : index
    %c0_0 = arith.constant 0 : index
    %0 = vector.load %arg9[%c0, %c0_0] : memref<1x20xf32, #tpu.memory_space<vmem>>, vector<1x20xf32>
    %c0_1 = arith.constant 0 : index
    %c0_2 = arith.constant 0 : index
    %1 = vector.load %arg10[%c0_1, %c0_2] : memref<1x20xf32, #tpu.memory_space<vmem>>, vector<1x20xf32>
    %c0_3 = arith.constant 0 : index
    %c0_4 = arith.constant 0 : index
    %2 = vector.load %arg0[%c0_3, %c0_4] : memref<16x20xf32, #tpu.memory_space<vmem>>, vector<16x20xf32>
    %cst = arith.constant dense<0.000000e+00> : vector<16xf32>
    %3 = vector.multi_reduction <add>, %2, %cst [1] : vector<16x20xf32> to vector<16xf32>
    %4 = vector.shape_cast %3 : vector<16xf32> to vector<16x1xf32>
    %cst_5 = arith.constant 2.000000e+01 : f32
    %5 = vector.broadcast %cst_5 : f32 to vector<16x1xf32>
    %6 = arith.divf %4, %5 : vector<16x1xf32>
    %7 = vector.broadcast %6 : vector<16x1xf32> to vector<16x20xf32>
    %8 = arith.subf %2, %7 : vector<16x20xf32>
    %9 = arith.mulf %8, %8 : vector<16x20xf32>
    %cst_6 = arith.constant dense<0.000000e+00> : vector<16xf32>
    %10 = vector.multi_reduction <add>, %9, %cst_6 [1] : vector<16x20xf32> to vector<16xf32>
    %11 = vector.shape_cast %10 : vector<16xf32> to vector<16x1xf32>
    %cst_7 = arith.constant 2.000000e+01 : f32
    %12 = vector.broadcast %cst_7 : f32 to vector<16x1xf32>
    %13 = arith.divf %11, %12 : vector<16x1xf32>
    %14 = vector.broadcast %6 : vector<16x1xf32> to vector<16x20xf32>
    %15 = arith.subf %2, %14 : vector<16x20xf32>
    %cst_8 = arith.constant 9.99999974E-6 : f32
    %16 = vector.broadcast %cst_8 : f32 to vector<16x1xf32>
    %17 = arith.addf %13, %16 : vector<16x1xf32>
    %18 = math.rsqrt %17 : vector<16x1xf32>
    %19 = vector.broadcast %18 : vector<16x1xf32> to vector<16x20xf32>
    %20 = arith.mulf %15, %19 : vector<16x20xf32>
    %21 = vector.broadcast %0 : vector<1x20xf32> to vector<16x20xf32>
    %22 = arith.mulf %20, %21 : vector<16x20xf32>
    %23 = vector.broadcast %1 : vector<1x20xf32> to vector<16x20xf32>
    %24 = arith.addf %22, %23 : vector<16x20xf32>
    %c0_9 = arith.constant 0 : index
    %c0_10 = arith.constant 0 : index
    %25 = vector.load %arg8[%c0_9, %c0_10] : memref<1x20xf32, #tpu.memory_space<vmem>>, vector<1x20xf32>
    %26 = vector.extract_strided_slice %24 {offsets = [0, 0], sizes = [8, 20], strides = [1, 1]} : vector<16x20xf32> to vector<8x20xf32>
    %cst_11 = arith.constant 0.000000e+00 : f32
    %27 = vector.broadcast %cst_11 : f32 to vector<8x20xf32>
    %c0_12 = arith.constant 0 : index
    %c0_13 = arith.constant 0 : index
    %c0_14 = arith.constant 0 : index
    %28 = vector.load %arg1[%c0_12, %c0_13, %c0_14] : memref<2x20x10xf32, #tpu.memory_space<vmem>>, vector<1x20x10xf32>
    %29 = vector.shape_cast %28 : vector<1x20x10xf32> to vector<20x10xf32>
    %cst_15 = arith.constant dense<0.000000e+00> : vector<8x10xf32>
    %30 = tpu.matmul %26, %29, %cst_15 {dimension_numbers = #tpu.dot_dimension_numbers<[1], [0], [0], [1], [0, 0, 1, 1], [], []>} : vector<8x20xf32>, vector<20x10xf32>, vector<8x10xf32> -> vector<8x10xf32>
    %c0_16 = arith.constant 0 : index
    %c0_17 = arith.constant 0 : index
    %c0_18 = arith.constant 0 : index
    %31 = vector.load %arg2[%c0_16, %c0_17, %c0_18] : memref<2x1x10xf32, #tpu.memory_space<vmem>>, vector<1x1x10xf32>
    %32 = vector.shape_cast %31 : vector<1x1x10xf32> to vector<1x10xf32>
    %33 = vector.broadcast %32 : vector<1x10xf32> to vector<8x10xf32>
    %34 = arith.addf %30, %33 : vector<8x10xf32>
    %c0_19 = arith.constant 0 : index
    %c0_20 = arith.constant 0 : index
    %c0_21 = arith.constant 0 : index
    %35 = vector.load %arg3[%c0_19, %c0_20, %c0_21] : memref<2x20x10xf32, #tpu.memory_space<vmem>>, vector<1x20x10xf32>
    %36 = vector.shape_cast %35 : vector<1x20x10xf32> to vector<20x10xf32>
    %cst_22 = arith.constant dense<0.000000e+00> : vector<8x10xf32>
    %37 = tpu.matmul %26, %36, %cst_22 {dimension_numbers = #tpu.dot_dimension_numbers<[1], [0], [0], [1], [0, 0, 1, 1], [], []>} : vector<8x20xf32>, vector<20x10xf32>, vector<8x10xf32> -> vector<8x10xf32>
    %c0_23 = arith.constant 0 : index
    %c0_24 = arith.constant 0 : index
    %c0_25 = arith.constant 0 : index
    %38 = vector.load %arg4[%c0_23, %c0_24, %c0_25] : memref<2x1x10xf32, #tpu.memory_space<vmem>>, vector<1x1x10xf32>
    %39 = vector.shape_cast %38 : vector<1x1x10xf32> to vector<1x10xf32>
    %40 = vector.broadcast %39 : vector<1x10xf32> to vector<8x10xf32>
    %41 = arith.addf %37, %40 : vector<8x10xf32>
    %c0_26 = arith.constant 0 : index
    %c0_27 = arith.constant 0 : index
    %c0_28 = arith.constant 0 : index
    %42 = vector.load %arg5[%c0_26, %c0_27, %c0_28] : memref<2x20x10xf32, #tpu.memory_space<vmem>>, vector<1x20x10xf32>
    %43 = vector.shape_cast %42 : vector<1x20x10xf32> to vector<20x10xf32>
    %cst_29 = arith.constant dense<0.000000e+00> : vector<8x10xf32>
    %44 = tpu.matmul %26, %43, %cst_29 {dimension_numbers = #tpu.dot_dimension_numbers<[1], [0], [0], [1], [0, 0, 1, 1], [], []>} : vector<8x20xf32>, vector<20x10xf32>, vector<8x10xf32> -> vector<8x10xf32>
    %c0_30 = arith.constant 0 : index
    %c0_31 = arith.constant 0 : index
    %c0_32 = arith.constant 0 : index
    %45 = vector.load %arg6[%c0_30, %c0_31, %c0_32] : memref<2x1x10xf32, #tpu.memory_space<vmem>>, vector<1x1x10xf32>
    %46 = vector.shape_cast %45 : vector<1x1x10xf32> to vector<1x10xf32>
    %47 = vector.broadcast %46 : vector<1x10xf32> to vector<8x10xf32>
    %48 = arith.addf %44, %47 : vector<8x10xf32>
    %cst_33 = arith.constant dense<0.000000e+00> : vector<8x8xf32>
    %49 = tpu.matmul %34, %41, %cst_33 {dimension_numbers = #tpu.dot_dimension_numbers<[1], [1], [0], [0], [0, 0, 1, 0], [], []>} : vector<8x10xf32>, vector<8x10xf32>, vector<8x8xf32> -> vector<8x8xf32>
    %cst_34 = arith.constant 0.316227764 : f32
    %50 = vector.broadcast %cst_34 : f32 to vector<8x8xf32>
    %51 = arith.mulf %49, %50 : vector<8x8xf32>
    %cst_35 = arith.constant dense<0xFF800000> : vector<8xf32>
    %52 = vector.multi_reduction <maximumf>, %51, %cst_35 [1] : vector<8x8xf32> to vector<8xf32>
    %53 = vector.shape_cast %52 : vector<8xf32> to vector<8x1xf32>
    %54 = vector.broadcast %53 : vector<8x1xf32> to vector<8x8xf32>
    %55 = arith.subf %51, %54 : vector<8x8xf32>
    %56 = math.exp %55 : vector<8x8xf32>
    %cst_36 = arith.constant dense<0.000000e+00> : vector<8xf32>
    %57 = vector.multi_reduction <add>, %56, %cst_36 [1] : vector<8x8xf32> to vector<8xf32>
    %58 = vector.shape_cast %57 : vector<8xf32> to vector<8x1xf32>
    %59 = tpu.reciprocal %58 {approx = true} : vector<8x1xf32> -> vector<8x1xf32>
    %60 = vector.broadcast %59 : vector<8x1xf32> to vector<8x8xf32>
    %61 = arith.mulf %56, %60 : vector<8x8xf32>
    %cst_37 = arith.constant dense<0.000000e+00> : vector<8x10xf32>
    %62 = tpu.matmul %61, %48, %cst_37 {dimension_numbers = #tpu.dot_dimension_numbers<[1], [0], [0], [1], [0, 0, 1, 1], [], []>} : vector<8x8xf32>, vector<8x10xf32>, vector<8x10xf32> -> vector<8x10xf32>
    %c0_38 = arith.constant 0 : index
    %c0_39 = arith.constant 0 : index
    %c0_40 = arith.constant 0 : index
    %63 = vector.load %arg7[%c0_38, %c0_39, %c0_40] : memref<2x10x20xf32, #tpu.memory_space<vmem>>, vector<1x10x20xf32>
    %64 = vector.shape_cast %63 : vector<1x10x20xf32> to vector<10x20xf32>
    %cst_41 = arith.constant dense<0.000000e+00> : vector<8x20xf32>
    %65 = tpu.matmul %62, %64, %cst_41 {dimension_numbers = #tpu.dot_dimension_numbers<[1], [0], [0], [1], [0, 0, 1, 1], [], []>} : vector<8x10xf32>, vector<10x20xf32>, vector<8x20xf32> -> vector<8x20xf32>
    %66 = arith.addf %27, %65 : vector<8x20xf32>
    %c1 = arith.constant 1 : index
    %c0_42 = arith.constant 0 : index
    %c0_43 = arith.constant 0 : index
    %67 = vector.load %arg1[%c1, %c0_42, %c0_43] : memref<2x20x10xf32, #tpu.memory_space<vmem>>, vector<1x20x10xf32>
    %68 = vector.shape_cast %67 : vector<1x20x10xf32> to vector<20x10xf32>
    %cst_44 = arith.constant dense<0.000000e+00> : vector<8x10xf32>
    %69 = tpu.matmul %26, %68, %cst_44 {dimension_numbers = #tpu.dot_dimension_numbers<[1], [0], [0], [1], [0, 0, 1, 1], [], []>} : vector<8x20xf32>, vector<20x10xf32>, vector<8x10xf32> -> vector<8x10xf32>
    %c1_45 = arith.constant 1 : index
    %c0_46 = arith.constant 0 : index
    %c0_47 = arith.constant 0 : index
    %70 = vector.load %arg2[%c1_45, %c0_46, %c0_47] : memref<2x1x10xf32, #tpu.memory_space<vmem>>, vector<1x1x10xf32>
    %71 = vector.shape_cast %70 : vector<1x1x10xf32> to vector<1x10xf32>
    %72 = vector.broadcast %71 : vector<1x10xf32> to vector<8x10xf32>
    %73 = arith.addf %69, %72 : vector<8x10xf32>
    %c1_48 = arith.constant 1 : index
    %c0_49 = arith.constant 0 : index
    %c0_50 = arith.constant 0 : index
    %74 = vector.load %arg3[%c1_48, %c0_49, %c0_50] : memref<2x20x10xf32, #tpu.memory_space<vmem>>, vector<1x20x10xf32>
    %75 = vector.shape_cast %74 : vector<1x20x10xf32> to vector<20x10xf32>
    %cst_51 = arith.constant dense<0.000000e+00> : vector<8x10xf32>
    %76 = tpu.matmul %26, %75, %cst_51 {dimension_numbers = #tpu.dot_dimension_numbers<[1], [0], [0], [1], [0, 0, 1, 1], [], []>} : vector<8x20xf32>, vector<20x10xf32>, vector<8x10xf32> -> vector<8x10xf32>
    %c1_52 = arith.constant 1 : index
    %c0_53 = arith.constant 0 : index
    %c0_54 = arith.constant 0 : index
    %77 = vector.load %arg4[%c1_52, %c0_53, %c0_54] : memref<2x1x10xf32, #tpu.memory_space<vmem>>, vector<1x1x10xf32>
    %78 = vector.shape_cast %77 : vector<1x1x10xf32> to vector<1x10xf32>
    %79 = vector.broadcast %78 : vector<1x10xf32> to vector<8x10xf32>
    %80 = arith.addf %76, %79 : vector<8x10xf32>
    %c1_55 = arith.constant 1 : index
    %c0_56 = arith.constant 0 : index
    %c0_57 = arith.constant 0 : index
    %81 = vector.load %arg5[%c1_55, %c0_56, %c0_57] : memref<2x20x10xf32, #tpu.memory_space<vmem>>, vector<1x20x10xf32>
    %82 = vector.shape_cast %81 : vector<1x20x10xf32> to vector<20x10xf32>
    %cst_58 = arith.constant dense<0.000000e+00> : vector<8x10xf32>
    %83 = tpu.matmul %26, %82, %cst_58 {dimension_numbers = #tpu.dot_dimension_numbers<[1], [0], [0], [1], [0, 0, 1, 1], [], []>} : vector<8x20xf32>, vector<20x10xf32>, vector<8x10xf32> -> vector<8x10xf32>
    %c1_59 = arith.constant 1 : index
    %c0_60 = arith.constant 0 : index
    %c0_61 = arith.constant 0 : index
    %84 = vector.load %arg6[%c1_59, %c0_60, %c0_61] : memref<2x1x10xf32, #tpu.memory_space<vmem>>, vector<1x1x10xf32>
    %85 = vector.shape_cast %84 : vector<1x1x10xf32> to vector<1x10xf32>
    %86 = vector.broadcast %85 : vector<1x10xf32> to vector<8x10xf32>
    %87 = arith.addf %83, %86 : vector<8x10xf32>
    %cst_62 = arith.constant dense<0.000000e+00> : vector<8x8xf32>
    %88 = tpu.matmul %73, %80, %cst_62 {dimension_numbers = #tpu.dot_dimension_numbers<[1], [1], [0], [0], [0, 0, 1, 0], [], []>} : vector<8x10xf32>, vector<8x10xf32>, vector<8x8xf32> -> vector<8x8xf32>
    %cst_63 = arith.constant 0.316227764 : f32
    %89 = vector.broadcast %cst_63 : f32 to vector<8x8xf32>
    %90 = arith.mulf %88, %89 : vector<8x8xf32>
    %cst_64 = arith.constant dense<0xFF800000> : vector<8xf32>
    %91 = vector.multi_reduction <maximumf>, %90, %cst_64 [1] : vector<8x8xf32> to vector<8xf32>
    %92 = vector.shape_cast %91 : vector<8xf32> to vector<8x1xf32>
    %93 = vector.broadcast %92 : vector<8x1xf32> to vector<8x8xf32>
    %94 = arith.subf %90, %93 : vector<8x8xf32>
    %95 = math.exp %94 : vector<8x8xf32>
    %cst_65 = arith.constant dense<0.000000e+00> : vector<8xf32>
    %96 = vector.multi_reduction <add>, %95, %cst_65 [1] : vector<8x8xf32> to vector<8xf32>
    %97 = vector.shape_cast %96 : vector<8xf32> to vector<8x1xf32>
    %98 = tpu.reciprocal %97 {approx = true} : vector<8x1xf32> -> vector<8x1xf32>
    %99 = vector.broadcast %98 : vector<8x1xf32> to vector<8x8xf32>
    %100 = arith.mulf %95, %99 : vector<8x8xf32>
    %cst_66 = arith.constant dense<0.000000e+00> : vector<8x10xf32>
    %101 = tpu.matmul %100, %87, %cst_66 {dimension_numbers = #tpu.dot_dimension_numbers<[1], [0], [0], [1], [0, 0, 1, 1], [], []>} : vector<8x8xf32>, vector<8x10xf32>, vector<8x10xf32> -> vector<8x10xf32>
    %c1_67 = arith.constant 1 : index
    %c0_68 = arith.constant 0 : index
    %c0_69 = arith.constant 0 : index
    %102 = vector.load %arg7[%c1_67, %c0_68, %c0_69] : memref<2x10x20xf32, #tpu.memory_space<vmem>>, vector<1x10x20xf32>
    %103 = vector.shape_cast %102 : vector<1x10x20xf32> to vector<10x20xf32>
    %cst_70 = arith.constant dense<0.000000e+00> : vector<8x20xf32>
    %104 = tpu.matmul %101, %103, %cst_70 {dimension_numbers = #tpu.dot_dimension_numbers<[1], [0], [0], [1], [0, 0, 1, 1], [], []>} : vector<8x10xf32>, vector<10x20xf32>, vector<8x20xf32> -> vector<8x20xf32>
    %105 = arith.addf %66, %104 : vector<8x20xf32>
    %106 = arith.addf %26, %105 : vector<8x20xf32>
    %107 = vector.broadcast %25 : vector<1x20xf32> to vector<8x20xf32>
    %108 = arith.addf %106, %107 : vector<8x20xf32>
    %cst_71 = arith.constant dense<0.000000e+00> : vector<8xf32>
    %109 = vector.multi_reduction <add>, %108, %cst_71 [1] : vector<8x20xf32> to vector<8xf32>
    %110 = vector.shape_cast %109 : vector<8xf32> to vector<8x1xf32>
    %cst_72 = arith.constant 2.000000e+01 : f32
    %111 = vector.broadcast %cst_72 : f32 to vector<8x1xf32>
    %112 = arith.divf %110, %111 : vector<8x1xf32>
    %113 = vector.broadcast %112 : vector<8x1xf32> to vector<8x20xf32>
    %114 = arith.subf %108, %113 : vector<8x20xf32>
    %115 = arith.mulf %114, %114 : vector<8x20xf32>
    %cst_73 = arith.constant dense<0.000000e+00> : vector<8xf32>
    %116 = vector.multi_reduction <add>, %115, %cst_73 [1] : vector<8x20xf32> to vector<8xf32>
    %117 = vector.shape_cast %116 : vector<8xf32> to vector<8x1xf32>
    %cst_74 = arith.constant 2.000000e+01 : f32
    %118 = vector.broadcast %cst_74 : f32 to vector<8x1xf32>
    %119 = arith.divf %117, %118 : vector<8x1xf32>
    %120 = vector.broadcast %112 : vector<8x1xf32> to vector<8x20xf32>
    %121 = arith.subf %108, %120 : vector<8x20xf32>
    %cst_75 = arith.constant 9.99999974E-6 : f32
    %122 = vector.broadcast %cst_75 : f32 to vector<8x1xf32>
    %123 = arith.addf %119, %122 : vector<8x1xf32>
    %124 = math.rsqrt %123 : vector<8x1xf32>
    %125 = vector.broadcast %124 : vector<8x1xf32> to vector<8x20xf32>
    %126 = arith.mulf %121, %125 : vector<8x20xf32>
    %127 = vector.broadcast %0 : vector<1x20xf32> to vector<8x20xf32>
    %128 = arith.mulf %126, %127 : vector<8x20xf32>
    %129 = vector.broadcast %1 : vector<1x20xf32> to vector<8x20xf32>
    %130 = arith.addf %128, %129 : vector<8x20xf32>
    %c0_76 = arith.constant 0 : index
    %c0_77 = arith.constant 0 : index
    %131 = vector.load %arg11[%c0_76, %c0_77] : memref<16x20xf32, #tpu.memory_space<vmem>>, vector<8x20xf32>
    tpu.vector_store %arg11[%c0_76, %c0_77], %130 {strides = array<i32>} : memref<16x20xf32, #tpu.memory_space<vmem>>, vector<8x20xf32>,
    %132 = vector.extract_strided_slice %24 {offsets = [8, 0], sizes = [8, 20], strides = [1, 1]} : vector<16x20xf32> to vector<8x20xf32>
    %cst_78 = arith.constant 0.000000e+00 : f32
    %133 = vector.broadcast %cst_78 : f32 to vector<8x20xf32>
    %c0_79 = arith.constant 0 : index
    %c0_80 = arith.constant 0 : index
    %c0_81 = arith.constant 0 : index
    %134 = vector.load %arg1[%c0_79, %c0_80, %c0_81] : memref<2x20x10xf32, #tpu.memory_space<vmem>>, vector<1x20x10xf32>
    %135 = vector.shape_cast %134 : vector<1x20x10xf32> to vector<20x10xf32>
    %cst_82 = arith.constant dense<0.000000e+00> : vector<8x10xf32>
    %136 = tpu.matmul %132, %135, %cst_82 {dimension_numbers = #tpu.dot_dimension_numbers<[1], [0], [0], [1], [0, 0, 1, 1], [], []>} : vector<8x20xf32>, vector<20x10xf32>, vector<8x10xf32> -> vector<8x10xf32>
    %c0_83 = arith.constant 0 : index
    %c0_84 = arith.constant 0 : index
    %c0_85 = arith.constant 0 : index
    %137 = vector.load %arg2[%c0_83, %c0_84, %c0_85] : memref<2x1x10xf32, #tpu.memory_space<vmem>>, vector<1x1x10xf32>
    %138 = vector.shape_cast %137 : vector<1x1x10xf32> to vector<1x10xf32>
    %139 = vector.broadcast %138 : vector<1x10xf32> to vector<8x10xf32>
    %140 = arith.addf %136, %139 : vector<8x10xf32>
    %c0_86 = arith.constant 0 : index
    %c0_87 = arith.constant 0 : index
    %c0_88 = arith.constant 0 : index
    %141 = vector.load %arg3[%c0_86, %c0_87, %c0_88] : memref<2x20x10xf32, #tpu.memory_space<vmem>>, vector<1x20x10xf32>
    %142 = vector.shape_cast %141 : vector<1x20x10xf32> to vector<20x10xf32>
    %cst_89 = arith.constant dense<0.000000e+00> : vector<8x10xf32>
    %143 = tpu.matmul %132, %142, %cst_89 {dimension_numbers = #tpu.dot_dimension_numbers<[1], [0], [0], [1], [0, 0, 1, 1], [], []>} : vector<8x20xf32>, vector<20x10xf32>, vector<8x10xf32> -> vector<8x10xf32>
    %c0_90 = arith.constant 0 : index
    %c0_91 = arith.constant 0 : index
    %c0_92 = arith.constant 0 : index
    %144 = vector.load %arg4[%c0_90, %c0_91, %c0_92] : memref<2x1x10xf32, #tpu.memory_space<vmem>>, vector<1x1x10xf32>
    %145 = vector.shape_cast %144 : vector<1x1x10xf32> to vector<1x10xf32>
    %146 = vector.broadcast %145 : vector<1x10xf32> to vector<8x10xf32>
    %147 = arith.addf %143, %146 : vector<8x10xf32>
    %c0_93 = arith.constant 0 : index
    %c0_94 = arith.constant 0 : index
    %c0_95 = arith.constant 0 : index
    %148 = vector.load %arg5[%c0_93, %c0_94, %c0_95] : memref<2x20x10xf32, #tpu.memory_space<vmem>>, vector<1x20x10xf32>
    %149 = vector.shape_cast %148 : vector<1x20x10xf32> to vector<20x10xf32>
    %cst_96 = arith.constant dense<0.000000e+00> : vector<8x10xf32>
    %150 = tpu.matmul %132, %149, %cst_96 {dimension_numbers = #tpu.dot_dimension_numbers<[1], [0], [0], [1], [0, 0, 1, 1], [], []>} : vector<8x20xf32>, vector<20x10xf32>, vector<8x10xf32> -> vector<8x10xf32>
    %c0_97 = arith.constant 0 : index
    %c0_98 = arith.constant 0 : index
    %c0_99 = arith.constant 0 : index
    %151 = vector.load %arg6[%c0_97, %c0_98, %c0_99] : memref<2x1x10xf32, #tpu.memory_space<vmem>>, vector<1x1x10xf32>
    %152 = vector.shape_cast %151 : vector<1x1x10xf32> to vector<1x10xf32>
    %153 = vector.broadcast %152 : vector<1x10xf32> to vector<8x10xf32>
    %154 = arith.addf %150, %153 : vector<8x10xf32>
    %cst_100 = arith.constant dense<0.000000e+00> : vector<8x8xf32>
    %155 = tpu.matmul %140, %147, %cst_100 {dimension_numbers = #tpu.dot_dimension_numbers<[1], [1], [0], [0], [0, 0, 1, 0], [], []>} : vector<8x10xf32>, vector<8x10xf32>, vector<8x8xf32> -> vector<8x8xf32>
    %cst_101 = arith.constant 0.316227764 : f32
    %156 = vector.broadcast %cst_101 : f32 to vector<8x8xf32>
    %157 = arith.mulf %155, %156 : vector<8x8xf32>
    %cst_102 = arith.constant dense<0xFF800000> : vector<8xf32>
    %158 = vector.multi_reduction <maximumf>, %157, %cst_102 [1] : vector<8x8xf32> to vector<8xf32>
    %159 = vector.shape_cast %158 : vector<8xf32> to vector<8x1xf32>
    %160 = vector.broadcast %159 : vector<8x1xf32> to vector<8x8xf32>
    %161 = arith.subf %157, %160 : vector<8x8xf32>
    %162 = math.exp %161 : vector<8x8xf32>
    %cst_103 = arith.constant dense<0.000000e+00> : vector<8xf32>
    %163 = vector.multi_reduction <add>, %162, %cst_103 [1] : vector<8x8xf32> to vector<8xf32>
    %164 = vector.shape_cast %163 : vector<8xf32> to vector<8x1xf32>
    %165 = tpu.reciprocal %164 {approx = true} : vector<8x1xf32> -> vector<8x1xf32>
    %166 = vector.broadcast %165 : vector<8x1xf32> to vector<8x8xf32>
    %167 = arith.mulf %162, %166 : vector<8x8xf32>
    %cst_104 = arith.constant dense<0.000000e+00> : vector<8x10xf32>
    %168 = tpu.matmul %167, %154, %cst_104 {dimension_numbers = #tpu.dot_dimension_numbers<[1], [0], [0], [1], [0, 0, 1, 1], [], []>} : vector<8x8xf32>, vector<8x10xf32>, vector<8x10xf32> -> vector<8x10xf32>
    %c0_105 = arith.constant 0 : index
    %c0_106 = arith.constant 0 : index
    %c0_107 = arith.constant 0 : index
    %169 = vector.load %arg7[%c0_105, %c0_106, %c0_107] : memref<2x10x20xf32, #tpu.memory_space<vmem>>, vector<1x10x20xf32>
    %170 = vector.shape_cast %169 : vector<1x10x20xf32> to vector<10x20xf32>
    %cst_108 = arith.constant dense<0.000000e+00> : vector<8x20xf32>
    %171 = tpu.matmul %168, %170, %cst_108 {dimension_numbers = #tpu.dot_dimension_numbers<[1], [0], [0], [1], [0, 0, 1, 1], [], []>} : vector<8x10xf32>, vector<10x20xf32>, vector<8x20xf32> -> vector<8x20xf32>
    %172 = arith.addf %133, %171 : vector<8x20xf32>
    %c1_109 = arith.constant 1 : index
    %c0_110 = arith.constant 0 : index
    %c0_111 = arith.constant 0 : index
    %173 = vector.load %arg1[%c1_109, %c0_110, %c0_111] : memref<2x20x10xf32, #tpu.memory_space<vmem>>, vector<1x20x10xf32>
    %174 = vector.shape_cast %173 : vector<1x20x10xf32> to vector<20x10xf32>
    %cst_112 = arith.constant dense<0.000000e+00> : vector<8x10xf32>
    %175 = tpu.matmul %132, %174, %cst_112 {dimension_numbers = #tpu.dot_dimension_numbers<[1], [0], [0], [1], [0, 0, 1, 1], [], []>} : vector<8x20xf32>, vector<20x10xf32>, vector<8x10xf32> -> vector<8x10xf32>
    %c1_113 = arith.constant 1 : index
    %c0_114 = arith.constant 0 : index
    %c0_115 = arith.constant 0 : index
    %176 = vector.load %arg2[%c1_113, %c0_114, %c0_115] : memref<2x1x10xf32, #tpu.memory_space<vmem>>, vector<1x1x10xf32>
    %177 = vector.shape_cast %176 : vector<1x1x10xf32> to vector<1x10xf32>
    %178 = vector.broadcast %177 : vector<1x10xf32> to vector<8x10xf32>
    %179 = arith.addf %175, %178 : vector<8x10xf32>
    %c1_116 = arith.constant 1 : index
    %c0_117 = arith.constant 0 : index
    %c0_118 = arith.constant 0 : index
    %180 = vector.load %arg3[%c1_116, %c0_117, %c0_118] : memref<2x20x10xf32, #tpu.memory_space<vmem>>, vector<1x20x10xf32>
    %181 = vector.shape_cast %180 : vector<1x20x10xf32> to vector<20x10xf32>
    %cst_119 = arith.constant dense<0.000000e+00> : vector<8x10xf32>
    %182 = tpu.matmul %132, %181, %cst_119 {dimension_numbers = #tpu.dot_dimension_numbers<[1], [0], [0], [1], [0, 0, 1, 1], [], []>} : vector<8x20xf32>, vector<20x10xf32>, vector<8x10xf32> -> vector<8x10xf32>
    %c1_120 = arith.constant 1 : index
    %c0_121 = arith.constant 0 : index
    %c0_122 = arith.constant 0 : index
    %183 = vector.load %arg4[%c1_120, %c0_121, %c0_122] : memref<2x1x10xf32, #tpu.memory_space<vmem>>, vector<1x1x10xf32>
    %184 = vector.shape_cast %183 : vector<1x1x10xf32> to vector<1x10xf32>
    %185 = vector.broadcast %184 : vector<1x10xf32> to vector<8x10xf32>
    %186 = arith.addf %182, %185 : vector<8x10xf32>
    %c1_123 = arith.constant 1 : index
    %c0_124 = arith.constant 0 : index
    %c0_125 = arith.constant 0 : index
    %187 = vector.load %arg5[%c1_123, %c0_124, %c0_125] : memref<2x20x10xf32, #tpu.memory_space<vmem>>, vector<1x20x10xf32>
    %188 = vector.shape_cast %187 : vector<1x20x10xf32> to vector<20x10xf32>
    %cst_126 = arith.constant dense<0.000000e+00> : vector<8x10xf32>
    %189 = tpu.matmul %132, %188, %cst_126 {dimension_numbers = #tpu.dot_dimension_numbers<[1], [0], [0], [1], [0, 0, 1, 1], [], []>} : vector<8x20xf32>, vector<20x10xf32>, vector<8x10xf32> -> vector<8x10xf32>
    %c1_127 = arith.constant 1 : index
    %c0_128 = arith.constant 0 : index
    %c0_129 = arith.constant 0 : index
    %190 = vector.load %arg6[%c1_127, %c0_128, %c0_129] : memref<2x1x10xf32, #tpu.memory_space<vmem>>, vector<1x1x10xf32>
    %191 = vector.shape_cast %190 : vector<1x1x10xf32> to vector<1x10xf32>
    %192 = vector.broadcast %191 : vector<1x10xf32> to vector<8x10xf32>
    %193 = arith.addf %189, %192 : vector<8x10xf32>
    %cst_130 = arith.constant dense<0.000000e+00> : vector<8x8xf32>
    %194 = tpu.matmul %179, %186, %cst_130 {dimension_numbers = #tpu.dot_dimension_numbers<[1], [1], [0], [0], [0, 0, 1, 0], [], []>} : vector<8x10xf32>, vector<8x10xf32>, vector<8x8xf32> -> vector<8x8xf32>
    %cst_131 = arith.constant 0.316227764 : f32
    %195 = vector.broadcast %cst_131 : f32 to vector<8x8xf32>
    %196 = arith.mulf %194, %195 : vector<8x8xf32>
    %cst_132 = arith.constant dense<0xFF800000> : vector<8xf32>
    %197 = vector.multi_reduction <maximumf>, %196, %cst_132 [1] : vector<8x8xf32> to vector<8xf32>
    %198 = vector.shape_cast %197 : vector<8xf32> to vector<8x1xf32>
    %199 = vector.broadcast %198 : vector<8x1xf32> to vector<8x8xf32>
    %200 = arith.subf %196, %199 : vector<8x8xf32>
    %201 = math.exp %200 : vector<8x8xf32>
    %cst_133 = arith.constant dense<0.000000e+00> : vector<8xf32>
    %202 = vector.multi_reduction <add>, %201, %cst_133 [1] : vector<8x8xf32> to vector<8xf32>
    %203 = vector.shape_cast %202 : vector<8xf32> to vector<8x1xf32>
    %204 = tpu.reciprocal %203 {approx = true} : vector<8x1xf32> -> vector<8x1xf32>
    %205 = vector.broadcast %204 : vector<8x1xf32> to vector<8x8xf32>
    %206 = arith.mulf %201, %205 : vector<8x8xf32>
    %cst_134 = arith.constant dense<0.000000e+00> : vector<8x10xf32>
    %207 = tpu.matmul %206, %193, %cst_134 {dimension_numbers = #tpu.dot_dimension_numbers<[1], [0], [0], [1], [0, 0, 1, 1], [], []>} : vector<8x8xf32>, vector<8x10xf32>, vector<8x10xf32> -> vector<8x10xf32>
    %c1_135 = arith.constant 1 : index
    %c0_136 = arith.constant 0 : index
    %c0_137 = arith.constant 0 : index
    %208 = vector.load %arg7[%c1_135, %c0_136, %c0_137] : memref<2x10x20xf32, #tpu.memory_space<vmem>>, vector<1x10x20xf32>
    %209 = vector.shape_cast %208 : vector<1x10x20xf32> to vector<10x20xf32>
    %cst_138 = arith.constant dense<0.000000e+00> : vector<8x20xf32>
    %210 = tpu.matmul %207, %209, %cst_138 {dimension_numbers = #tpu.dot_dimension_numbers<[1], [0], [0], [1], [0, 0, 1, 1], [], []>} : vector<8x10xf32>, vector<10x20xf32>, vector<8x20xf32> -> vector<8x20xf32>
    %211 = arith.addf %172, %210 : vector<8x20xf32>
    %212 = arith.addf %132, %211 : vector<8x20xf32>
    %213 = vector.broadcast %25 : vector<1x20xf32> to vector<8x20xf32>
    %214 = arith.addf %212, %213 : vector<8x20xf32>
    %cst_139 = arith.constant dense<0.000000e+00> : vector<8xf32>
    %215 = vector.multi_reduction <add>, %214, %cst_139 [1] : vector<8x20xf32> to vector<8xf32>
    %216 = vector.shape_cast %215 : vector<8xf32> to vector<8x1xf32>
    %cst_140 = arith.constant 2.000000e+01 : f32
    %217 = vector.broadcast %cst_140 : f32 to vector<8x1xf32>
    %218 = arith.divf %216, %217 : vector<8x1xf32>
    %219 = vector.broadcast %218 : vector<8x1xf32> to vector<8x20xf32>
    %220 = arith.subf %214, %219 : vector<8x20xf32>
    %221 = arith.mulf %220, %220 : vector<8x20xf32>
    %cst_141 = arith.constant dense<0.000000e+00> : vector<8xf32>
    %222 = vector.multi_reduction <add>, %221, %cst_141 [1] : vector<8x20xf32> to vector<8xf32>
    %223 = vector.shape_cast %222 : vector<8xf32> to vector<8x1xf32>
    %cst_142 = arith.constant 2.000000e+01 : f32
    %224 = vector.broadcast %cst_142 : f32 to vector<8x1xf32>
    %225 = arith.divf %223, %224 : vector<8x1xf32>
    %226 = vector.broadcast %218 : vector<8x1xf32> to vector<8x20xf32>
    %227 = arith.subf %214, %226 : vector<8x20xf32>
    %cst_143 = arith.constant 9.99999974E-6 : f32
    %228 = vector.broadcast %cst_143 : f32 to vector<8x1xf32>
    %229 = arith.addf %225, %228 : vector<8x1xf32>
    %230 = math.rsqrt %229 : vector<8x1xf32>
    %231 = vector.broadcast %230 : vector<8x1xf32> to vector<8x20xf32>
    %232 = arith.mulf %227, %231 : vector<8x20xf32>
    %233 = vector.broadcast %0 : vector<1x20xf32> to vector<8x20xf32>
    %234 = arith.mulf %232, %233 : vector<8x20xf32>
    %235 = vector.broadcast %1 : vector<1x20xf32> to vector<8x20xf32>
    %236 = arith.addf %234, %235 : vector<8x20xf32>
    %c8 = arith.constant 8 : index
    %c0_144 = arith.constant 0 : index
    %237 = vector.load %arg11[%c8, %c0_144] : memref<16x20xf32, #tpu.memory_space<vmem>>, vector<8x20xf32>
    tpu.vector_store %arg11[%c8, %c0_144], %236 {strides = array<i32>} : memref<16x20xf32, #tpu.memory_space<vmem>>, vector<8x20xf32>,
    return
  }
}

</mosaic_0001>

<bundles_post_ra>
// kernel: tpu_custom_call.1
= control target key start
LH: loop header
LB: loop body
LE: loop exit
PB: predicated region body
PF: predicated region fallthrough
CT: control target
= control target key end

     0   :  { %vm43_vm0 = vcmask 162816   ;;  %s3006_s0 = inlined_call_operand.vmem [shape: f32[16,20], index: 0, kind: input, shape index: {}]   ;;  %s3007_s1 = inlined_call_operand.vmem [shape: f32[2,20,10], index: 1, kind: input, shape index: {}]   ;;  %s3008_s2 = inlined_call_operand.vmem [shape: f32[2,1,10], index: 2, kind: input, shape index: {}]   ;;  %s3009_s3 = inlined_call_operand.vmem [shape: f32[2,20,10], index: 3, kind: input, shape index: {}]   ;;  %s3010_s4 = inlined_call_operand.vmem [shape: f32[2,1,10], index: 4, kind: input, shape index: {}]   ;;  %s3011_s5 = inlined_call_operand.vmem [shape: f32[2,20,10], index: 5, kind: input, shape index: {}]   ;;  %s3012_s6 = inlined_call_operand.vmem [shape: f32[2,1,10], index: 6, kind: input, shape index: {}]   ;;  %s3013_s7 = inlined_call_operand.vmem [shape: f32[2,10,20], index: 7, kind: input, shape index: {}]   ;;  %s3014_s8 = inlined_call_operand.vmem [shape: f32[1,20], index: 8, kind: input, shape index: {}]   ;;  %s3015_s9 = inlined_call_operand.vmem [shape: f32[1,20], index: 9, kind: input, shape index: {}]   ;;  %s3016_s10 = inlined_call_operand.vmem [shape: f32[1,20], index: 10, kind: input, shape index: {}]   ;;  %s3017_s11 = inlined_call_operand.hbm [shape: f32[16,20], index: 11, kind: output, shape index: {}]  }
   0x1   :  { %v41_v0 = vld [vmem:[%s3006_s0] sm:$0xff] }
   0x2   :  { %16 = vsyncpa [#allocation3], 0  ;;  %v44_v1 = vsel %vm43_vm0, %v41_v0, 0.0  ;;  %v88_v7 = vld [vmem:[%s3007_s1] sm:$0xff]  ;;  %v89_v8 = vld [vmem:[%s3007_s1 + $0x8] sm:$0xff]  ;;  %v2561_v12 = vmov 0.0|0.0  }
   0x3   :  { %45 = vadd.xlane.f32.xlu0 %v44_v1  ;;  %v2639_v9 = vpack.c.bf16 %v89_v8, %v88_v7  ;;  %v175_v10 = vld [vmem:[%s3009_s3] sm:$0xff]  ;;  %v176_v11 = vld [vmem:[%s3009_s3 + $0x8] sm:$0xff]  ;;  %2454 = vmatprep.subr.bf16.mxu0 %v2561_v12  ;;  %v2562_v14 = vmov 0.0   ;;  %v90_v15 = vld [vmem:[%s3007_s1 + $0x10] sm:$0xf]  ;;  %vm101_vm1 = vcmask 1043456  }
   0x4   :  { %2457 = vmatprep.subr.bf16.mxu1 %v2561_v12  ;;  %v2649_v13 = vpack.c.bf16 %v176_v11, %v175_v10  ;;  %v177_v16 = vld [vmem:[%s3009_s3 + $0x10] sm:$0xf]  ;;  %vm2563_vm2 = vmmov 0   ;;  %v2672_v21 = vld [vmem:[%s3015_s9] ss:$0 sm:$0xff]  ;;  %v259_v24 = vld [vmem:[%s3011_s5 + $0x8] sm:$0xff] }
   0x5   :  { %2456 = vmatpush3.bf16.msra.mxu0 %v2639_v9  ;;  %2284 = vmatprep.mubr.msk.f32.mxu0 %vm2563_vm2, %v2562_v14  ;;  %v258_v23 = vld [vmem:[%s3011_s5] sm:$0xff]  ;;  %v2129_v29 = vld [vmem:[%s3007_s1 + $0x18] sm:$0xff]  ;;  %v260_v31 = vld [vmem:[%s3011_s5 + $0x10] sm:$0xf]  ;;  %vm341_vm3 = vcmask 80896   ;;  %vm419_vm4 = vcmask 64512  }
   0x6   :  { %2459 = vmatpush3.bf16.msra.mxu1 %v2649_v13  ;;  %2282 = vmatprep.subr.mxu0 %v2562_v14  ;;  %v2683_v25 = vld [vmem:[%s3016_s10] ss:$0 sm:$0xff]  ;;  %v2686_v27 = vpack.c.bf16 %v259_v24, %v258_v23  ;;  %v2143_v33 = vld [vmem:[%s3011_s5 + $0x18] sm:$0xff]  ;;  %v2131_v35 = vld [vmem:[%s3007_s1 + $0x28] sm:$0xf]  ;;  %vm928_vm5 = vcmask 1041408  }
   0x7   :  { %2291 = vmatprep.subr.mxu1 %v2562_v14  ;;  %2293 = vmatprep.mubr.msk.f32.mxu1 %vm2563_vm2, %v2562_v14  ;;  %v2130_v30 = vld [vmem:[%s3007_s1 + $0x20] sm:$0xff]  ;;  %v2145_v37 = vld [vmem:[%s3011_s5 + $0x28] sm:$0xf]  ;;  %vm2564_vm6 = vmmov 1  }
   0x8   :  { %v2710_v32 = vpack.c.bf16 %v2130_v30, %v2129_v29  ;;  %v2144_v34 = vld [vmem:[%s3011_s5 + $0x20] sm:$0xff]  ;;  %v2138_v7 = vld [vmem:[%s3009_s3 + $0x28] sm:$0xf]  ;;  %vm2836_vm7 = vmpackc.low %vm928_vm5, %vm2564_vm6 }
   0x9   :  { %2283 = vmatpush3.msk.msra.mxu0 %vm101_vm1, %v90_v15  ;;  %v2729_v36 = vpack.c.bf16 %v2144_v34, %v2143_v33  ;;  %v2751_v38 = vld [vmem:[%s3010_s4] ss:$0 sm:$0xff]  ;;  %v2775_v52 = vld [vmem:[%s3012_s6 + $0x1] ss:$0 sm:$0xff]  ;;  %v42_v24 = vld [vmem:[%s3006_s0 + $0x8] sm:$0xff] }
   0xa   :  { %2292 = vmatpush3.msk.msra.mxu1 %vm101_vm1, %v177_v16  ;;  %2460 = vmatprep.subr.bf16.mxu0 %v2561_v12  ;;  %v2756_v41 = vld [vmem:[%s3008_s2] ss:$0 sm:$0xff]  ;;  %v2806_v11 = vld [vmem:[%s3010_s4 + $0x1] ss:$0 sm:$0xff]  ;;  %v47_v29 = vsel %vm43_vm0, %v42_v24, 0.0 }
   0xb   :  { %2305 = vmatprep.subr.mxu1 %v2562_v14  ;;  %v2764_v46 = vld [vmem:[%s3012_s6] ss:$0 sm:$0xff]  ;;  %v2811_v16 = vld [vmem:[%s3008_s2 + $0x1] ss:$0 sm:$0xff] }
  0x90   :  { %v46_v2 = vpop.xlane.xlu0 %45 }
  0x91   :  { %v51_v3 = vmul.f32 0.05, %v46_v2  ;;  %v2136_v2 = vld [vmem:[%s3009_s3 + $0x18] sm:$0xff] }
  0x93   :  { %v53_v4 = vsub.f32 %v41_v0, %v51_v3  ;;  %v2137_v3 = vld [vmem:[%s3009_s3 + $0x20] sm:$0xff] }
  0x95   :  { %v55_v5 = vmul.f32 %v53_v4, %v53_v4 }
  0x97   :  { %v57_v6 = vsel %vm43_vm0, %v55_v5, 0.0  ;;  %v2787_v5 = vpack.c.bf16 %v2137_v3, %v2136_v2 }
  0x98   :  { %58 = vadd.xlane.f32.xlu0 %v57_v6 }
 0x125   :  { %v59_v17 = vpop.xlane.xlu0 %58 }
 0x126   :  { %v63_v18 = vmul.f32 0.05, %v59_v17 }
 0x128   :  { %v65_v19 = vadd.f32 1e-05, %v63_v18 }
 0x12a   :  { %2513 = vrsqrt.f32 %v65_v19 }
 0x134   :  { %v2514_v20 = vpop.eup %2513 }
 0x135   :  { %v69_v22 = vmul.f32 %v2514_v20, %v53_v4 }
 0x137   :  { %v77_v26 = vmul.f32 %v2672_v21, %v69_v22 }
 0x139   :  { %v2689_v28 = vadd.f32 %v2683_v25, %v77_v26 }
 0x13b   :  { %2285 = vmatmul.mubr.msk.f32.vlgmr.msra.gmra.mrb[0].mxu0 %vm43_vm0, %v2689_v28  ;;  %2294 = vmatmul.mubr.msk.f32.vlgmr.msra.gmra.mrb[0].mxu1 %vm43_vm0, %v2689_v28 }
 0x13c   :  { %2462 = vmatpush3.bf16.msra.mxu0 %v2686_v27  ;;  %2302 = vmatprep.mubr.msk.f32.mxu0 %vm2563_vm2, %v2562_v14 }
 0x13d   :  { %2300 = vmatprep.subr.mxu0 %v2562_v14  ;;  %2307 = vmatprep.mubr.msk.f32.mxu1 %vm2563_vm2, %v2562_v14 }
 0x140   :  { %2301 = vmatpush3.msk.msra.mxu0 %vm101_vm1, %v260_v31 }
 0x141   :  { %2303 = vmatmul.mubr.msk.f32.vlgmr.msra.gmra.mrb[2].mxu0 %vm43_vm0, %v2689_v28  ;;  %2463 = vmatprep.subr.bf16.mxu0 %v2561_v12 }
 0x142   :  { %2465 = vmatpush3.bf16.msra.mxu0 %v2710_v32  ;;  %2321 = vmatprep.mubr.msk.f32.mxu0 %vm2563_vm2, %v2562_v14 }
 0x143   :  { %2319 = vmatprep.subr.mxu0 %v2562_v14 }
 0x146   :  { %2320 = vmatpush3.msk.msra.mxu0 %vm101_vm1, %v2131_v35 }
 0x147   :  { %2322 = vmatmul.mubr.msk.f32.vlgmr.msra.gmra.mrb[4].mxu0 %vm43_vm0, %v2689_v28  ;;  %2469 = vmatprep.subr.bf16.mxu0 %v2561_v12 }
 0x148   :  { %2471 = vmatpush3.bf16.msra.mxu0 %v2729_v36  ;;  %2339 = vmatprep.mubr.msk.f32.mxu0 %vm2563_vm2, %v2562_v14 }
 0x149   :  { %2337 = vmatprep.subr.mxu0 %v2562_v14 }
 0x14c   :  { %2338 = vmatpush3.msk.msra.mxu0 %vm101_vm1, %v2145_v37 }
 0x14d   :  { %2340 = vmatmul.mubr.msk.f32.vlgmr.msra.gmra.mrb[6].mxu0 %vm43_vm0, %v2689_v28  ;;  %2347 = vmatprep.subr.mxu0 %v2562_v14 }
 0x14e   :  { %2349 = vmatprep.mubr.msk.f32.mxu0 %vm2563_vm2, %v2562_v14 }
 0x20e   :  { %v171_v39 = vpop.f32.mrb[0].mxu0  ;;  %v254_v40 = vpop.f32.mrb[0].mxu1 }
 0x20f   :  { %v255_v42 = vadd.f32 %v2751_v38, %v254_v40  ;;  %v2286_v43 = vpop.f32.mrb[1].mxu0  ;;  %v2295_v44 = vpop.f32.mrb[1].mxu1  ;;  %v172_v45 = vadd.f32 %v2756_v41, %v171_v39 }
 0x210   :  { %v2830_v44 = vld [vmem:[%s3013_s7 + $0x10] sm:$0xff] }
 0x211   :  { %2306 = vmatpush3.xpose.msk.msra.mxu1 %vm341_vm3, %v255_v42 }
 0x212   :  { %2310 = vmatprep.subr.mxu1 %v2562_v14 }
 0x214   :  { %v337_v47 = vpop.f32.mrb[2].mxu0  ;;  %2308 = vmatmul.mubr.msk.f32.vlgmr.msra.gmra.mrb[2].mxu1 %vm341_vm3, %v172_v45  ;;  %v2154_v45 = vld [vmem:[%s3013_s7 + $0x18] sm:$0x3] }
 0x215   :  { %v338_v48 = vadd.f32 %v2764_v46, %v337_v47  ;;  %v2304_v49 = vpop.f32.mrb[3].mxu0  ;;  %2312 = vmatprep.mubr.msk.f32.mxu1 %vm2563_vm2, %v2562_v14  ;;  %v2473_v47 = vpack.c.bf16 %v2154_v45, %v2830_v44 }
 0x217   :  { %2311 = vmatpush3.msra.mxu1 %v338_v48 }
 0x218   :  { %2466 = vmatprep.subr.bf16.mxu1 %v2561_v12 }
 0x21a   :  { %v587_v50 = vpop.f32.mrb[4].mxu0 }
 0x21b   :  { %v2323_v51 = vpop.f32.mrb[5].mxu0  ;;  %v588_v19 = vadd.f32 %v2811_v16, %v587_v50 }
 0x220   :  { %v757_v53 = vpop.f32.mrb[6].mxu0 }
 0x221   :  { %v758_v54 = vadd.f32 %v2775_v52, %v757_v53  ;;  %v2341_v55 = vpop.f32.mrb[7].mxu0 }
 0x222   :  { %v505_v55 = vld [vmem:[%s3013_s7 + $0x8] sm:$0x3] }
 0x223   :  { %2348 = vmatpush3.msra.mxu0 %v758_v54  ;;  %v2846_v54 = vld [vmem:[%s3013_s7] sm:$0xff] }
 0x224   :  { %2476 = vmatprep.subr.bf16.mxu0 %v2561_v12 }
 0x2e7   :  { %v414_v56 = vpop.f32.mrb[2].mxu1 }
 0x2e8   :  { %v418_v57 = vmul.f32 0.31622776, %v414_v56  ;;  %v2309_v58 = vpop.f32.mrb[3].mxu1 }
 0x2ea   :  { %v420_v59 = vsel %vm419_vm4, %v418_v57, -inf }
 0x2eb   :  { %421 = vmax.xlane.f32.xlu1 %v420_v59 }
 0x378   :  { %v422_v60 = vpop.xlane.xlu1 %421 }
 0x379   :  { %v423_v61 = vsub.f32 %v418_v57, %v422_v60  ;;  %v2477_v57 = vpack.c.bf16 %v505_v55, %v2846_v54 }
 0x37b   :  { %v424_v62 = vmul.f32 1.442695, %v423_v61  ;;  %v1190_v61 = vld [vmem:[%s3009_s3 + $0x10] sm:$0xf] }
 0x37d   :  { %2515 = vpow2.f32 %v424_v62 }
 0x387   :  { %v2516_v63 = vpop.eup %2515 }
 0x388   :  { %v426_v0 = vsel %vm419_vm4, %v2516_v63, 0.0 }
 0x389   :  { %427 = vadd.xlane.f32.xlu1 %v426_v0 }
 0x416   :  { %v428_v1 = vpop.xlane.xlu1 %427 }
 0x417   :  { %2517 = vrcp.f32 %v428_v1  ;;  %v1104_v1 = vld [vmem:[%s3007_s1 + $0x10] sm:$0xf] }
 0x421   :  { %v2518_v4 = vpop.eup %2517 }
 0x422   :  { %v430_v6 = vmul.f32 %v2518_v4, %v2516_v63 }
 0x424   :  { %2313 = vmatmul.mubr.msk.f32.vlgmr.msra.gmra.mrb[4].mxu1 %vm419_vm4, %v430_v6 }
 0x425   :  { %2468 = vmatpush3.bf16.msra.mxu1 %v2787_v5  ;;  %2330 = vmatprep.mubr.msk.f32.mxu1 %vm2563_vm2, %v2562_v14 }
 0x426   :  { %2328 = vmatprep.subr.mxu1 %v2562_v14 }
 0x429   :  { %2329 = vmatpush3.msk.msra.mxu1 %vm101_vm1, %v2138_v7 }
 0x42a   :  { %2331 = vmatmul.mubr.msk.f32.vlgmr.msra.gmra.mrb[6].mxu1 %vm43_vm0, %v2689_v28  ;;  %2342 = vmatprep.subr.mxu1 %v2562_v14 }
 0x42b   :  { %2344 = vmatprep.mubr.msk.f32.mxu1 %vm2563_vm2, %v2562_v14 }
 0x4f7   :  { %v500_v8 = vpop.f32.mrb[4].mxu1 }
 0x4f8   :  { %v2314_v10 = vpop.f32.mrb[5].mxu1 }
 0x4fd   :  { %v672_v15 = vpop.f32.mrb[6].mxu1 }
 0x4fe   :  { %v673_v17 = vadd.f32 %v2806_v11, %v672_v15  ;;  %v2332_v18 = vpop.f32.mrb[7].mxu1 }
 0x500   :  { %2343 = vmatpush3.xpose.msk.msra.mxu1 %vm341_vm3, %v673_v17 }
 0x501   :  { %2472 = vmatprep.subr.bf16.mxu1 %v2561_v12 }
 0x503   :  { %2345 = vmatmul.mubr.msk.f32.vlgmr.msra.gmra.mrb[8].mxu1 %vm341_vm3, %v588_v19 }
 0x504   :  { %2356 = vmatprep.mubr.msk.f32.mxu1 %vm2563_vm2, %v2562_v14  ;;  %2475 = vmatpush3.bf16.msk.msra.mxu1 %vm2836_vm7, %v2473_v47 }
 0x505   :  { %2480 = vmatprep.subr.bf16.mxu1 %v2561_v12 }
 0x5d6   :  { %v833_v20 = vpop.f32.mrb[8].mxu1 }
 0x5d7   :  { %v837_v22 = vmul.f32 0.31622776, %v833_v20  ;;  %v2346_v23 = vpop.f32.mrb[9].mxu1 }
 0x5d9   :  { %v838_v26 = vsel %vm419_vm4, %v837_v22, -inf }
 0x5da   :  { %839 = vmax.xlane.f32.xlu0 %v838_v26 }
 0x5de   :  { %48 = vadd.xlane.f32.xlu0 %v47_v29 }
 0x667   :  { %v840_v30 = vpop.xlane.xlu0 %839 }
 0x668   :  { %v841_v31 = vsub.f32 %v837_v22, %v840_v30 }
 0x66a   :  { %v842_v33 = vmul.f32 1.442695, %v841_v31 }
 0x66b   :  { %v49_v34 = vpop.xlane.xlu0 %48 }
 0x66c   :  { %2519 = vpow2.f32 %v842_v33  ;;  %v52_v35 = vmul.f32 0.05, %v49_v34 }
 0x66e   :  { %v54_v37 = vsub.f32 %v42_v24, %v52_v35 }
 0x670   :  { %v56_v39 = vmul.f32 %v54_v37, %v54_v37 }
 0x672   :  { %v60_v43 = vsel %vm43_vm0, %v56_v39, 0.0 }
 0x676   :  { %v2520_v40 = vpop.eup %2519 }
 0x677   :  { %v844_v42 = vsel %vm419_vm4, %v2520_v40, 0.0 }
 0x678   :  { %845 = vadd.xlane.f32.xlu1 %v844_v42 }
 0x67c   :  { %61 = vadd.xlane.f32.xlu1 %v60_v43 }
 0x705   :  { %v846_v49 = vpop.xlane.xlu1 %845 }
 0x706   :  { %2521 = vrcp.f32 %v846_v49 }
 0x709   :  { %v62_v50 = vpop.xlane.xlu1 %61 }
 0x70a   :  { %v64_v51 = vmul.f32 0.05, %v62_v50 }
 0x70c   :  { %v66_v53 = vadd.f32 1e-05, %v64_v51 }
 0x70e   :  { %2523 = vrsqrt.f32 %v66_v53 }
 0x710   :  { %v2522_v56 = vpop.eup %2521 }
 0x711   :  { %v848_v58 = vmul.f32 %v2522_v56, %v2520_v40 }
 0x713   :  { %2350 = vmatmul.mubr.msk.f32.vlgmr.msra.gmra.mrb[8].mxu0 %vm419_vm4, %v848_v58 }
 0x714   :  { %2479 = vmatpush3.bf16.msk.msra.mxu0 %vm2836_vm7, %v2477_v57  ;;  %2363 = vmatprep.mubr.msk.f32.mxu0 %vm2563_vm2, %v2562_v14 }
 0x715   :  { %2483 = vmatprep.subr.bf16.mxu0 %v2561_v12 }
 0x717   :  { %2364 = vmatmul.mubr.msk.f32.vlgmr.msra.gmra.mrb[10].mxu0 %vm341_vm3, %v500_v8 }
 0x718   :  { %v2524_v59 = vpop.eup %2523  ;;  %2485 = vmatpush3.bf16.msra.mxu0 %v2649_v13  ;;  %2381 = vmatprep.mubr.msk.f32.mxu0 %vm2563_vm2, %v2562_v14 }
 0x719   :  { %v70_v60 = vmul.f32 %v2524_v59, %v54_v37  ;;  %2379 = vmatprep.subr.mxu0 %v2562_v14 }
 0x71b   :  { %v78_v62 = vmul.f32 %v2672_v21, %v70_v60 }
 0x71c   :  { %2380 = vmatpush3.msk.msra.mxu0 %vm101_vm1, %v1190_v61 }
 0x71d   :  { %v2869_v63 = vadd.f32 %v2683_v25, %v78_v62  ;;  %2393 = vmatprep.subr.mxu0 %v2562_v14 }
 0x71f   :  { %2382 = vmatmul.mubr.msk.f32.vlgmr.msra.gmra.mrb[12].mxu0 %vm43_vm0, %v2869_v63 }
 0x720   :  { %2395 = vmatprep.mubr.msk.f32.mxu0 %vm2563_vm2, %v2562_v14 }
 0x7e6   :  { %v918_v13 = vpop.f32.mrb[8].mxu0 }
 0x7e7   :  { %v2351_v0 = vpop.f32.mrb[9].mxu0  ;;  %2357 = vmatmul.mubr.msk.f32.vlgmr.msra.gmra.mrb[10].mxu1 %vm341_vm3, %v918_v13 }
 0x7e8   :  { %2482 = vmatpush3.bf16.msra.mxu1 %v2639_v9  ;;  %2372 = vmatprep.mubr.msk.f32.mxu1 %vm2563_vm2, %v2562_v14  ;;  %v1273_v9 = vld [vmem:[%s3011_s5 + $0x10] sm:$0xf] }
 0x7e9   :  { %2370 = vmatprep.subr.mxu1 %v2562_v14 }
 0x7ea   :  { %v1074_v2 = vpop.f32.mrb[10].mxu0 }
 0x7eb   :  { %v2365_v3 = vpop.f32.mrb[11].mxu0 }
 0x7ec   :  { %2371 = vmatpush3.msk.msra.mxu1 %vm101_vm1, %v1104_v1 }
 0x7ed   :  { %2373 = vmatmul.mubr.msk.f32.vlgmr.msra.gmra.mrb[12].mxu1 %vm43_vm0, %v2869_v63  ;;  %2486 = vmatprep.subr.bf16.mxu1 %v2561_v12 }
 0x7ee   :  { %2488 = vmatpush3.bf16.msra.mxu1 %v2686_v27  ;;  %2390 = vmatprep.mubr.msk.f32.mxu1 %vm2563_vm2, %v2562_v14 }
 0x7ef   :  { %2388 = vmatprep.subr.mxu1 %v2562_v14 }
 0x7f2   :  { %2389 = vmatpush3.msk.msra.mxu1 %vm101_vm1, %v1273_v9  ;;  %v1267_v4 = vpop.f32.mrb[12].mxu0  ;;  %v2197_v9 = vld [vmem:[%s3013_s7 + $0x18] sm:$0x3] }
 0x7f3   :  { %2391 = vmatmul.mubr.msk.f32.vlgmr.msra.gmra.mrb[14].mxu1 %vm43_vm0, %v2869_v63  ;;  %v1268_v6 = vadd.f32 %v2751_v38, %v1267_v4  ;;  %v2383_v7 = vpop.f32.mrb[13].mxu0  ;;  %2398 = vmatprep.subr.mxu1 %v2562_v14  ;;  %v2174_v38 = vld [vmem:[%s3007_s1 + $0x28] sm:$0xf]  ;;  %v2499_v4 = vpack.c.bf16 %v2197_v9, %v2830_v44 }
 0x7f4   :  { %2400 = vmatprep.mubr.msk.f32.mxu1 %vm2563_vm2, %v2562_v14 }
 0x7f5   :  { %2394 = vmatpush3.xpose.msk.msra.mxu0 %vm341_vm3, %v1268_v6 }
 0x7f6   :  { %2489 = vmatprep.subr.bf16.mxu0 %v2561_v12 }
 0x8ba   :  { %v998_v27 = vpop.f32.mrb[10].mxu1 }
 0x8bb   :  { %v2904_v8 = vadd.f32 %v1074_v2, %v998_v27  ;;  %v2358_v10 = vpop.f32.mrb[11].mxu1 }
 0x8bc   :  { %v1516_v10 = vld [vmem:[%s3013_s7 + $0x8] sm:$0x3]  ;;  %s2565_s7 = smov [#allocation2]  }
 0x8bd   :  { %v1078_v53 = vadd.f32 %v2904_v8, %v2689_v28  ;;  %s2104_s27 = sshll.u32 %s2565_s7, 4  ;;  %s2105_s27 = int_to_ptr.vmem [resolvable:$true] %s2104_s27 }
 0x8be   :  { %s2537_s4 = scalar_lea.vmem %s2105_s27, 256  ;;  %p2542_p1 = scmp.lt.s32.totalorder %s2105_s27, %s2105_s27 }
 0x8bf   :  { %p2538_p0 = scmp.ne.s32.totalorder %s2105_s27, %s2537_s4  ;;  %p2543_p2 = scmp.lt.s32.totalorder %s2537_s4, %s2537_s4 }
 0x8c0   :  { %v1184_v15 = vpop.f32.mrb[12].mxu1 }
 0x8c1   :  { %v1185_v17 = vadd.f32 %v2756_v41, %v1184_v15  ;;  %v2374_v18 = vpop.f32.mrb[13].mxu1  ;;  %p2544_p3 = por %p2543_p2, %p2542_p1 }
 0x8c3   :  { %2396 = vmatmul.mubr.msk.f32.vlgmr.msra.gmra.mrb[14].mxu0 %vm341_vm3, %v1185_v17  ;;  %p2545_p4 = pnand %p2544_p3, %p2538_p0 }
 0x8c4   :  { %2491 = vmatpush3.bf16.msra.mxu0 %v2710_v32  ;;  %2409 = vmatprep.mubr.msk.f32.mxu0 %vm2563_vm2, %v2562_v14  ;;  %v2188_v32 = vld [vmem:[%s3011_s5 + $0x28] sm:$0xf] }
 0x8c5   :  { %2407 = vmatprep.subr.mxu0 %v2562_v14 }
 0x8c6   :  { %v1350_v19 = vpop.f32.mrb[14].mxu1 }
 0x8c7   :  { %v1351_v20 = vadd.f32 %v2764_v46, %v1350_v19  ;;  %v2392_v22 = vpop.f32.mrb[15].mxu1 }
 0x8c8   :  { %2408 = vmatpush3.msk.msra.mxu0 %vm101_vm1, %v2174_v38  ;;  %v2503_v38 = vpack.c.bf16 %v1516_v10, %v2846_v54 }
 0x8c9   :  { %2410 = vmatmul.mubr.msk.f32.vlgmr.msra.gmra.mrb[16].mxu0 %vm43_vm0, %v2869_v63  ;;  %2495 = vmatprep.subr.bf16.mxu0 %v2561_v12 }
 0x8ca   :  { %2399 = vmatpush3.msra.mxu1 %v1351_v20  ;;  %2497 = vmatpush3.bf16.msra.mxu0 %v2729_v36 }
 0x8cb   :  { %2425 = vmatprep.subr.mxu0 %v2562_v14  ;;  %2427 = vmatprep.mubr.msk.f32.mxu0 %vm2563_vm2, %v2562_v14 }
 0x8cc   :  { %2492 = vmatprep.subr.bf16.mxu1 %v2561_v12 }
 0x8ce   :  { %2426 = vmatpush3.msk.msra.mxu0 %vm101_vm1, %v2188_v32 }
 0x8cf   :  { %2428 = vmatmul.mubr.msk.f32.vlgmr.msra.gmra.mrb[18].mxu0 %vm43_vm0, %v2869_v63  ;;  %2435 = vmatprep.subr.mxu0 %v2562_v14 }
 0x8d0   :  { %2437 = vmatprep.mubr.msk.f32.mxu0 %vm2563_vm2, %v2562_v14 }
 0x996   :  { %v1426_v36 = vpop.f32.mrb[14].mxu0 }
 0x997   :  { %v1430_v41 = vmul.f32 0.31622776, %v1426_v36  ;;  %v2397_v46 = vpop.f32.mrb[15].mxu0 }
 0x999   :  { %v1431_v23 = vsel %vm419_vm4, %v1430_v41, -inf }
 0x99a   :  { %1432 = vmax.xlane.f32.xlu0 %v1431_v23 }
 0x99c   :  { %v1596_v24 = vpop.f32.mrb[16].mxu0 }
 0x99d   :  { %v2411_v26 = vpop.f32.mrb[17].mxu0  ;;  %v1597_v51 = vadd.f32 %v2811_v16, %v1596_v24 }
 0x9a2   :  { %v1762_v29 = vpop.f32.mrb[18].mxu0 }
 0x9a3   :  { %v1763_v30 = vadd.f32 %v2775_v52, %v1762_v29  ;;  %v2429_v31 = vpop.f32.mrb[19].mxu0  ;;  %v2181_v52 = vld [vmem:[%s3009_s3 + $0x28] sm:$0xf] }
 0x9a5   :  { %2436 = vmatpush3.msra.mxu0 %v1763_v30 }
 0x9a6   :  { %2502 = vmatprep.subr.bf16.mxu0 %v2561_v12 }
 0xa27   :  { %v1433_v33 = vpop.xlane.xlu0 %1432 }
 0xa28   :  { %v1434_v34 = vsub.f32 %v1430_v41, %v1433_v33 }
 0xa2a   :  { %v1435_v35 = vmul.f32 1.442695, %v1434_v34 }
 0xa2c   :  { %2525 = vpow2.f32 %v1435_v35 }
 0xa36   :  { %v2526_v37 = vpop.eup %2525 }
 0xa37   :  { %v1437_v39 = vsel %vm419_vm4, %v2526_v37, 0.0 }
 0xa38   :  { %1438 = vadd.xlane.f32.xlu1 %v1437_v39 }
 0xac5   :  { %v1439_v40 = vpop.xlane.xlu1 %1438 }
 0xac6   :  { %2527 = vrcp.f32 %v1439_v40 }
 0xad0   :  { %v2528_v42 = vpop.eup %2527 }
 0xad1   :  { %v1441_v43 = vmul.f32 %v2528_v42, %v2526_v37 }
 0xad3   :  { %2401 = vmatmul.mubr.msk.f32.vlgmr.msra.gmra.mrb[16].mxu1 %vm419_vm4, %v1441_v43 }
 0xad4   :  { %2494 = vmatpush3.bf16.msra.mxu1 %v2787_v5  ;;  %2418 = vmatprep.mubr.msk.f32.mxu1 %vm2563_vm2, %v2562_v14 }
 0xad5   :  { %2416 = vmatprep.subr.mxu1 %v2562_v14 }
 0xad8   :  { %2417 = vmatpush3.msk.msra.mxu1 %vm101_vm1, %v2181_v52 }
 0xad9   :  { %2419 = vmatmul.mubr.msk.f32.vlgmr.msra.gmra.mrb[18].mxu1 %vm43_vm0, %v2869_v63  ;;  %2430 = vmatprep.subr.mxu1 %v2562_v14 }
 0xada   :  { %2432 = vmatprep.mubr.msk.f32.mxu1 %vm2563_vm2, %v2562_v14 }
 0xba6   :  { %v1511_v5 = vpop.f32.mrb[16].mxu1 }
 0xba7   :  { %v2402_v45 = vpop.f32.mrb[17].mxu1 }
 0xbac   :  { %v1679_v47 = vpop.f32.mrb[18].mxu1 }
 0xbad   :  { %v1680_v49 = vadd.f32 %v2806_v11, %v1679_v47  ;;  %v2420_v50 = vpop.f32.mrb[19].mxu1  ;;  %v2159_v11 = vld [vmem:[%s3014_s8] ss:$0 sm:$0xff] }
 0xbae   :  { %v1085_v16 = vadd.f32 %v2159_v11, %v1078_v53 }
 0xbaf   :  { %2431 = vmatpush3.xpose.msk.msra.mxu1 %vm341_vm3, %v1680_v49 }
 0xbb0   :  { %2498 = vmatprep.subr.bf16.mxu1 %v2561_v12  ;;  %v1086_v12 = vsel %vm43_vm0, %v1085_v16, 0.0 }
 0xbb2   :  { %2433 = vmatmul.mubr.msk.f32.vlgmr.msra.gmra.mrb[20].mxu1 %vm341_vm3, %v1597_v51 }
 0xbb3   :  { %2444 = vmatprep.mubr.msk.f32.mxu1 %vm2563_vm2, %v2562_v14  ;;  %2501 = vmatpush3.bf16.msk.msra.mxu1 %vm2836_vm7, %v2499_v4 }
 0xc85   :  { %v1838_v55 = vpop.f32.mrb[20].mxu1 }
 0xc86   :  { %v1842_v56 = vmul.f32 0.31622776, %v1838_v55  ;;  %v2434_v57 = vpop.f32.mrb[21].mxu1 }
 0xc88   :  { %v1843_v58 = vsel %vm419_vm4, %v1842_v56, -inf }
 0xc89   :  { %1844 = vmax.xlane.f32.xlu0 %v1843_v58 }
 0xc8d   :  { %1087 = vadd.xlane.f32.xlu0 %v1086_v12 }
 0xd16   :  { %v1845_v59 = vpop.xlane.xlu0 %1844 }
 0xd17   :  { %v1846_v60 = vsub.f32 %v1842_v56, %v1845_v59 }
 0xd19   :  { %v1847_v61 = vmul.f32 1.442695, %v1846_v60 }
 0xd1a   :  { %v1088_v62 = vpop.xlane.xlu0 %1087 }
 0xd1b   :  { %2529 = vpow2.f32 %v1847_v61  ;;  %v1089_v28 = vmul.f32 0.05, %v1088_v62 }
 0xd1d   :  { %v1090_v13 = vsub.f32 %v1085_v16, %v1089_v28 }
 0xd1f   :  { %v1091_v0 = vmul.f32 %v1090_v13, %v1090_v13 }
 0xd21   :  { %v1092_v1 = vsel %vm43_vm0, %v1091_v0, 0.0 }
 0xd22   :  { %1093 = vadd.xlane.f32.xlu0 %v1092_v1 }
 0xd25   :  { %v2530_v2 = vpop.eup %2529 }
 0xd26   :  { %v1849_v3 = vsel %vm419_vm4, %v2530_v2, 0.0 }
 0xd27   :  { %1850 = vadd.xlane.f32.xlu1 %v1849_v3 }
 0xdaf   :  { %v1094_v6 = vpop.xlane.xlu0 %1093 }
 0xdb0   :  { %v1095_v7 = vmul.f32 0.05, %v1094_v6 }
 0xdb2   :  { %v1096_v27 = vadd.f32 1e-05, %v1095_v7 }
 0xdb4   :  { %2531 = vrsqrt.f32 %v1096_v27  ;;  %v1851_v8 = vpop.xlane.xlu1 %1850 }
 0xdb5   :  { %2533 = vrcp.f32 %v1851_v8 }
 0xdbe   :  { %v2532_v15 = vpop.eup %2531 }
 0xdbf   :  { %v2534_v17 = vpop.eup %2533  ;;  %v1098_v18 = vmul.f32 %v2532_v15, %v1090_v13 }
 0xdc0   :  { %v1853_v19 = vmul.f32 %v2534_v17, %v2530_v2 }
 0xdc1   :  { %v1099_v44 = vmul.f32 %v2672_v21, %v1098_v18 }
 0xdc2   :  { %2438 = vmatmul.mubr.msk.f32.vlgmr.msra.gmra.mrb[20].mxu0 %vm419_vm4, %v1853_v19 }
 0xdc3   :  { %2505 = vmatpush3.bf16.msk.msra.mxu0 %vm2836_vm7, %v2503_v38  ;;  %2451 = vmatprep.mubr.msk.f32.mxu0 %vm2563_vm2, %v2562_v14  ;;  %v1100_v20 = vadd.f32 %v2683_v25, %v1099_v44 }
 0xdc5   :  { %1101 = vst.msk [vmem:[#allocation2] sm:$0xff] %vm43_vm0, %v1100_v20 }
 0xdc6   :  { %2452 = vmatmul.mubr.msk.f32.vlgmr.msra.gmra.mrb[22].mxu0 %vm341_vm3, %v1511_v5 }
 0xe95   :  { %v1923_v22 = vpop.f32.mrb[20].mxu0 }
 0xe96   :  { %v2439_v32 = vpop.f32.mrb[21].mxu0  ;;  %2445 = vmatmul.mubr.msk.f32.vlgmr.msra.gmra.mrb[22].mxu1 %vm341_vm3, %v1923_v22 }
 0xe99   :  { %v2077_v54 = vpop.f32.mrb[22].mxu0 }
 0xe9a   :  { %v2453_v36 = vpop.f32.mrb[23].mxu0 }
 0xf69   :  { %v2001_v41 = vpop.f32.mrb[22].mxu1 }
 0xf6a   :  { %v2078_v46 = vadd.f32 %v2077_v54, %v2001_v41  ;;  %v2446_v23 = vpop.f32.mrb[23].mxu1 }
 0xf6c   :  { %v2081_v48 = vadd.f32 %v2078_v46, %v2869_v63 }
 0xf6e   :  { %v2082_v24 = vadd.f32 %v2159_v11, %v2081_v48 }
 0xf70   :  { %v2083_v14 = vsel %vm43_vm0, %v2082_v24, 0.0 }
 0xf71   :  { %2084 = vadd.xlane.f32.xlu1 %v2083_v14 }
 0xffe   :  { %v2085_v26 = vpop.xlane.xlu1 %2084 }
 0xfff   :  { %v2086_v29 = vmul.f32 0.05, %v2085_v26 }
0x1001   :  { %v2087_v30 = vsub.f32 %v2082_v24, %v2086_v29 }
0x1003   :  { %v2088_v31 = vmul.f32 %v2087_v30, %v2087_v30 }
0x1005   :  { %v2089_v33 = vsel %vm43_vm0, %v2088_v31, 0.0 }
0x1006   :  { %2090 = vadd.xlane.f32.xlu1 %v2089_v33 }
0x1093   :  { %v2091_v34 = vpop.xlane.xlu1 %2090 }
0x1094   :  { %v2092_v35 = vmul.f32 0.05, %v2091_v34 }
0x1096   :  { %v2093_v37 = vadd.f32 1e-05, %v2092_v35 }
0x1098   :  { %2535 = vrsqrt.f32 %v2093_v37 }
0x10a2   :  { %v2536_v39 = vpop.eup %2535 }
0x10a3   :  { %v2095_v40 = vmul.f32 %v2536_v39, %v2087_v30 }
0x10a5   :  { %v2096_v63 = vmul.f32 %v2672_v21, %v2095_v40 }
0x10a7   :  { %v2097_v42 = vadd.f32 %v2683_v25, %v2096_v63 }
0x10a9   :  { %2098 = vst.msk [vmem:[#allocation2 + $0x8] sm:$0xff] %vm43_vm0, %v2097_v42 }
0x10aa   :  { %2548 = shalt.err (!%p2545_p4)
}
0x10ab   :  { %s2549_s28 = scalar_lea.hbm %s3017_s11, 256 }
0x10ac   :  { %p2550_p5 = scmp.ne.s32.totalorder %s3017_s11, %s2549_s28  ;;  %p2553_p6 = scmp.lt.u32.totalorder %s2549_s28, %s3017_s11 }
0x10ae   :  { %p2555_p7 = pnand %p2553_p6, %p2550_p5 }
0x10b0   :  { %2558 = shalt.err (!%p2555_p7)
}
0x10b1   :  { %s2566_s14 = smov 128   ;;  %s2567_s15 = smov 8  }
0x10b2   :  { %2110 = dma.vmem_to_hbm [thread:$0]  %s2105_s27, 256, %s3017_s11, [#allocation3], %s2566_s14, %s2566_s14, %s2567_s15  }
0x10b3   :  { %2559 = dma.done.wait [#allocation3], 256  }
0x10b4   :  { %2560 = vsyncadd [#allocation3], 4294967040 }
0x10b5   :  { %2114 = vsyncpa [#allocation3], 1 }

</bundles_post_ra>
